<compile_context>
chip_gen: v7x
topology: tpu7x:2x2x1
jax: 0.10.0
libtpu: 0.0.40
codegen_flags: <defaults>
</compile_context>

<pallas_src>
import jax
import jax.numpy as jnp
from jax.experimental import pallas as pl
from jax.experimental.pallas import tpu as pltpu


# --------------------------------------------------------------------------
# Generation-gated sizing (v5e/v6e: 128 MiB physical VMEM, v7x: 64 MiB)
# --------------------------------------------------------------------------
def _tpu_vmem_capacity():
    try:
        return int(pltpu.get_tpu_info().vmem_capacity_bytes)
    except Exception:
        return 128 * 1024 * 1024


_VMEM_CAP = _tpu_vmem_capacity()
_BIG_VMEM = _VMEM_CAP >= 100 * 1024 * 1024
_VMEM_LIMIT = (64 if _BIG_VMEM else 40) * 1024 * 1024
_MM_TM_CAP = 512 if _BIG_VMEM else 256
_MM_TN_CAP = 512 if _BIG_VMEM else 256
_MM_TK_CAP = 512
_CONV_ACC_ELEMS = (1 << 19) if _BIG_VMEM else (1 << 18)   # f32 elems per conv row-tile acc
_BN_TILE_BUDGET = (2 << 20) if _BIG_VMEM else (1 << 20)   # bytes per BN x block


def _pick_tile(n, max_t, base):
    """Largest multiple of `base` <= max_t that divides n, else n (full dim)."""
    t = (min(max_t, n) // base) * base
    while t >= base:
        if n % t == 0:
            return t
        t -= base
    return n


def _full_spec(shape):
    nd = len(shape)
    return pl.BlockSpec(shape, lambda *_: (0,) * nd)


# --------------------------------------------------------------------------
# Pallas kernel 1: K-tiled MXU matmul (bf16 operands, f32 accumulator)
# --------------------------------------------------------------------------
def _make_matmul_kernel(has_bias):
    def kernel(*refs):
        if has_bias:
            a_ref, b_ref, bias_ref, o_ref, acc_ref = refs
        else:
            a_ref, b_ref, o_ref, acc_ref = refs
        k = pl.program_id(2)

        @pl.when(k == 0)
        def _():
            acc_ref[...] = jnp.zeros_like(acc_ref)

        acc_ref[...] += jnp.dot(a_ref[...], b_ref[...],
                                preferred_element_type=jnp.float32)

        @pl.when(k == pl.num_programs(2) - 1)
        def _():
            out = acc_ref[...]
            if has_bias:
                out = out + bias_ref[...]
            o_ref[...] = out.astype(o_ref.dtype)
    return kernel


def pallas_matmul(a, b, bias=None, out_dtype=jnp.float32):
    """(M,K) @ (K,N) -> (M,N), bf16 MXU inputs, f32 acc, lane-dense stores."""
    M, K = a.shape
    K2, N = b.shape
    assert K == K2
    a = a.astype(jnp.bfloat16)
    b = b.astype(jnp.bfloat16)
    Mp = M + (-M) % 8                      # sublane-aligned rows
    Np = N + (-N) % 128                    # lane-dense output columns
    if Mp != M:
        a = jnp.pad(a, ((0, Mp - M), (0, 0)))
    if Np != N:
        b = jnp.pad(b, ((0, 0), (0, Np - N)))
    tm = _pick_tile(Mp, _MM_TM_CAP, 8)
    tn = _pick_tile(Np, _MM_TN_CAP, 128)
    tk = _pick_tile(K, _MM_TK_CAP, 128)

    in_specs = [pl.BlockSpec((tm, tk), lambda i, j, k: (i, k)),
                pl.BlockSpec((tk, tn), lambda i, j, k: (k, j))]
    args = [a, b]
    if bias is not None:
        bias_p = bias.astype(jnp.float32)
        if Np != N:
            bias_p = jnp.pad(bias_p, (0, Np - N))
        in_specs.append(pl.BlockSpec((1, tn), lambda i, j, k: (0, j)))
        args.append(bias_p.reshape(1, Np))

    out = pl.pallas_call(
        _make_matmul_kernel(bias is not None),
        out_shape=jax.ShapeDtypeStruct((Mp, Np), out_dtype),
        grid=(Mp // tm, Np // tn, K // tk),
        in_specs=in_specs,
        out_specs=pl.BlockSpec((tm, tn), lambda i, j, k: (i, j)),
        scratch_shapes=[pltpu.VMEM((tm, tn), jnp.float32)],
        compiler_params=pltpu.CompilerParams(
            dimension_semantics=("parallel", "parallel", "arbitrary"),
            vmem_limit_bytes=_VMEM_LIMIT),
    )(*args)
    if Mp != M or Np != N:
        out = out[:M, :N]
    return out


# --------------------------------------------------------------------------
# Pallas kernel 2: fused conv (stride 1 or 2 via phase decomposition),
# row-tiled, kw taps merged into the MXU contraction (K = kw*cin).
# --------------------------------------------------------------------------
def _make_conv_kernel(kh, kw, stride, Hop, th, Wo, cin, cout):
    def kernel(x_ref, w_ref, o_ref):
        # x_ref : (1, stride*stride*Hop, Wop, cin) bf16 phase-decomposed image
        # w_ref : (kh, kw*cin, cout) bf16
        # o_ref : (1, th, Wo, cout) bf16
        r0 = pl.multiple_of(pl.program_id(1) * th, th)
        acc = jnp.zeros((th * Wo, cout), jnp.float32)
        for di in range(kh):
            parts = []
            for dj in range(kw):
                phase = (di % stride) * stride + (dj % stride)
                row0 = phase * Hop + di // stride
                c0 = dj // stride
                parts.append(x_ref[0, pl.ds(r0 + row0, th), c0:c0 + Wo, :])
            a = parts[0] if kw == 1 else jnp.concatenate(parts, axis=-1)
            a = a.reshape(th * Wo, kw * cin)
            acc = acc + jnp.dot(a, w_ref[di],
                                preferred_element_type=jnp.float32)
        o_ref[...] = acc.reshape(1, th, Wo, cout).astype(o_ref.dtype)
    return kernel


def _conv2d_fused(x, w, stride, padding):
    kh, kw, cin, cout = w.shape
    N, H, W, _ = x.shape
    Ho = (H + 2 * padding - kh) // stride + 1
    Wo = (W + 2 * padding - kw) // stride + 1
    Hop = Ho + (kh - 1) // stride
    Wop = Wo + (kw - 1) // stride
    Hp, Wp = stride * Hop, stride * Wop
    pad_h, pad_w = Hp - H - padding, Wp - W - padding
    assert pad_h >= 0 and pad_w >= 0
    xb = jnp.pad(x.astype(jnp.bfloat16),
                 ((0, 0), (padding, pad_h), (padding, pad_w), (0, 0)))
    # phases[n, a*stride+b, i, j, c] = xb[n, i*stride+a, j*stride+b, c]
    ph = xb.reshape(N, Hop, stride, Wop, stride, cin)
    ph = ph.transpose(0, 2, 4, 1, 3, 5).reshape(N, stride * stride * Hop, Wop, cin)
    wmat = w.astype(jnp.bfloat16).reshape(kh, kw * cin, cout)

    max_th = max(1, _CONV_ACC_ELEMS // max(1, Wo * cout))
    th = _pick_tile(Ho, max_th, 1)

    # TODO(synk): per-block BN partial sums could be emitted here as extra
    # outputs to fuse the BN statistics pass into the conv.
    return pl.pallas_call(
        _make_conv_kernel(kh, kw, stride, Hop, th, Wo, cin, cout),
        out_shape=jax.ShapeDtypeStruct((N, Ho, Wo, cout), jnp.bfloat16),
        grid=(N, Ho // th),
        in_specs=[pl.BlockSpec((1, stride * stride * Hop, Wop, cin),
                               lambda n, t: (n, 0, 0, 0)),
                  pl.BlockSpec((kh, kw * cin, cout), lambda n, t: (0, 0, 0))],
        out_specs=pl.BlockSpec((1, th, Wo, cout), lambda n, t: (n, t, 0, 0)),
        compiler_params=pltpu.CompilerParams(
            dimension_semantics=("parallel", "parallel"),
            vmem_limit_bytes=_VMEM_LIMIT),
    )(ph, wmat)


def _conv2d_1x1(x, w, stride):
    _, _, cin, cout = w.shape
    N = x.shape[0]
    xs = x[:, ::stride, ::stride, :] if stride > 1 else x
    Ho, Wo = xs.shape[1], xs.shape[2]
    y = pallas_matmul(xs.reshape(N * Ho * Wo, cin), w.reshape(cin, cout),
                      out_dtype=jnp.bfloat16)
    return y.reshape(N, Ho, Wo, cout)


def _conv2d_im2col(x, w, stride, padding):
    # only used for the 3-channel stem (K = kh*kw*cin = 27 -> tiny blow-up)
    kh, kw, cin, cout = w.shape
    N, H, W, _ = x.shape
    Ho = (H + 2 * padding - kh) // stride + 1
    Wo = (W + 2 * padding - kw) // stride + 1
    xb = x.astype(jnp.bfloat16)
    if padding:
        xb = jnp.pad(xb, ((0, 0), (padding, padding), (padding, padding), (0, 0)))
    cols = [xb[:, i:i + stride * Ho:stride, j:j + stride * Wo:stride, :]
            for i in range(kh) for j in range(kw)]
    patches = cols[0] if len(cols) == 1 else jnp.concatenate(cols, axis=-1)
    y = pallas_matmul(patches.reshape(N * Ho * Wo, kh * kw * cin),
                      w.reshape(kh * kw * cin, cout), out_dtype=jnp.bfloat16)
    return y.reshape(N, Ho, Wo, cout)


def conv2d(x, w, *, stride, padding):
    kh, kw, cin, _ = w.shape
    if kh == 1 and kw == 1 and padding == 0:
        return _conv2d_1x1(x, w, stride)
    if cin < 8:
        return _conv2d_im2col(x, w, stride, padding)
    return _conv2d_fused(x, w, stride, padding)


# --------------------------------------------------------------------------
# Pallas kernels 3+4: tiled two-pass training-mode SplitBatchNorm (bf16 I/O)
# --------------------------------------------------------------------------
def _bn_stats_kernel(x_ref, sum_ref, sq_ref):
    @pl.when((pl.program_id(0) == 0) & (pl.program_id(1) == 0))
    def _():
        sum_ref[...] = jnp.zeros_like(sum_ref)
        sq_ref[...] = jnp.zeros_like(sq_ref)
    x = x_ref[...].astype(jnp.float32)               # (1, S, hw_t, C)
    sum_ref[...] += jnp.sum(x, axis=(0, 2))
    sq_ref[...] += jnp.sum(x * x, axis=(0, 2))


def _make_bn_apply_kernel(relu, has_res):
    def kernel(*refs):
        if has_res:
            x_ref, sc_ref, sh_ref, r_ref, o_ref = refs
        else:
            x_ref, sc_ref, sh_ref, o_ref = refs
        y = x_ref[...].astype(jnp.float32) * sc_ref[...] + sh_ref[...]
        if has_res:
            y = y + r_ref[...].astype(jnp.float32)
        if relu:
            y = jnp.maximum(y, 0.0)
        o_ref[...] = y.astype(o_ref.dtype)
    return kernel


def split_batchnorm(x, gamma, beta, *, num_splits, eps=1e-5,
                    relu=False, residual=None):
    """SplitBatchNorm (training mode) on NHWC input, fused add+ReLU optional."""
    N, H, W, C = x.shape
    assert N % num_splits == 0
    G = N // num_splits
    HW = H * W
    # sample n = g*num_splits + s  ->  split s (matches torch .view semantics)
    xg = x.reshape(G, num_splits, HW, C)
    bytes_per_hw = num_splits * C * x.dtype.itemsize
    hw_cap = max(8, (_BN_TILE_BUDGET // bytes_per_hw) // 8 * 8)
    hw_t = _pick_tile(HW, hw_cap, 8)
    grid = (G, HW // hw_t)
    x_spec = pl.BlockSpec((1, num_splits, hw_t, C), lambda g, t: (g, 0, t, 0))

    # TODO(synk): on v7x the stats pass could emit per-core partial sums
    # (leading partial index) to split across both TensorCores.
    ssum, ssq = pl.pallas_call(
        _bn_stats_kernel,
        out_shape=(jax.ShapeDtypeStruct((num_splits, C), jnp.float32),
                   jax.ShapeDtypeStruct((num_splits, C), jnp.float32)),
        grid=grid,
        in_specs=[x_spec],
        out_specs=(pl.BlockSpec((num_splits, C), lambda g, t: (0, 0)),
                   pl.BlockSpec((num_splits, C), lambda g, t: (0, 0))),
        compiler_params=pltpu.CompilerParams(
            dimension_semantics=("arbitrary", "arbitrary"),
            vmem_limit_bytes=_VMEM_LIMIT),
    )(xg)

    count = jnp.float32(G * HW)
    mean = ssum / count
    var = jnp.maximum(ssq / count - mean * mean, 0.0)
    scale = gamma.astype(jnp.float32).reshape(1, C) * jax.lax.rsqrt(var + eps)
    shift = beta.astype(jnp.float32).reshape(1, C) - mean * scale
    scale4 = scale.reshape(1, num_splits, 1, C)
    shift4 = shift.reshape(1, num_splits, 1, C)

    args = [xg, scale4, shift4]
    in_specs = [x_spec,
                pl.BlockSpec((1, num_splits, 1, C), lambda g, t: (0, 0, 0, 0)),
                pl.BlockSpec((1, num_splits, 1, C), lambda g, t: (0, 0, 0, 0))]
    if residual is not None:
        args.append(residual.reshape(G, num_splits, HW, C))
        in_specs.append(x_spec)

    out = pl.pallas_call(
        _make_bn_apply_kernel(relu, residual is not None),
        out_shape=jax.ShapeDtypeStruct(xg.shape, jnp.bfloat16),
        grid=grid,
        in_specs=in_specs,
        out_specs=x_spec,
        compiler_params=pltpu.CompilerParams(
            dimension_semantics=("parallel", "parallel"),
            vmem_limit_bytes=_VMEM_LIMIT),
    )(*args)
    return out.reshape(N, H, W, C)


# --------------------------------------------------------------------------
# Pallas kernels 5+6: MoCo head (normalize, positive logit, Kq-tiled queue)
# --------------------------------------------------------------------------
def _make_norm_kernel(inv_T):
    def kernel(q_ref, k_ref, qn_ref, kn_ref, aug_ref):
        q = q_ref[...]
        k = k_ref[...]
        qn = q * jax.lax.rsqrt(jnp.maximum(jnp.sum(q * q, axis=1, keepdims=True),
                                           1e-24))
        kn = k * jax.lax.rsqrt(jnp.maximum(jnp.sum(k * k, axis=1, keepdims=True),
                                           1e-24))
        qn_ref[...] = qn.astype(qn_ref.dtype)        # bf16, feeds queue matmul
        kn_ref[...] = kn                             # f32, enqueued into queue
        aug_ref[...] = jnp.sum(qn * kn, axis=1, keepdims=True) * inv_T
    return kernel


def _make_queue_kernel(inv_T):
    def kernel(qn_ref, queue_ref, lab_ref, lq_ref, lqo_ref, tqo_ref):
        lqo_ref[...] = jnp.dot(qn_ref[...], queue_ref[...],
                               preferred_element_type=jnp.float32) * inv_T
        lab = lab_ref[...]                           # (N, 1) int32
        lq = lq_ref[...]                             # (1, tk) int32
        tqo_ref[...] = ((lab == lq) & (lab != -1)).astype(jnp.float32)
    return kernel


def moco_head(q, k, queue, labels, label_queue, T):
    N, D = q.shape
    Kq = queue.shape[1]
    inv_T = 1.0 / T

    qn, kn, aug = pl.pallas_call(
        _make_norm_kernel(inv_T),
        out_shape=(jax.ShapeDtypeStruct((N, D), jnp.bfloat16),
                   jax.ShapeDtypeStruct((N, D), jnp.float32),
                   jax.ShapeDtypeStruct((N, 1), jnp.float32)),
        grid=(1,),
        in_specs=[_full_spec((N, D)), _full_spec((N, D))],
        out_specs=(_full_spec((N, D)), _full_spec((N, D)), _full_spec((N, 1))),
    )(q.astype(jnp.float32), k.astype(jnp.float32))

    tk = _pick_tile(Kq, 2048, 128)
    lab2 = labels.reshape(N, 1).astype(jnp.int32)
    lq2 = label_queue.reshape(1, Kq).astype(jnp.int32)
    lqueue, tqueue = pl.pallas_call(
        _make_queue_kernel(inv_T),
        out_shape=(jax.ShapeDtypeStruct((N, Kq), jnp.float32),
                   jax.ShapeDtypeStruct((N, Kq), jnp.float32)),
        grid=(Kq // tk,),
        in_specs=[pl.BlockSpec((N, D), lambda j: (0, 0)),
                  pl.BlockSpec((D, tk), lambda j: (0, j)),
                  pl.BlockSpec((N, 1), lambda j: (0, 0)),
                  pl.BlockSpec((1, tk), lambda j: (0, j))],
        out_specs=(pl.BlockSpec((N, tk), lambda j: (0, j)),
                   pl.BlockSpec((N, tk), lambda j: (0, j))),
        compiler_params=pltpu.CompilerParams(
            dimension_semantics=("parallel",),
            vmem_limit_bytes=_VMEM_LIMIT),
    )(qn, queue.astype(jnp.bfloat16), lab2, lq2)

    logits = jnp.concatenate([aug, lqueue], axis=1)
    targets = jnp.concatenate([jnp.ones((N, 1), jnp.float32), tqueue], axis=1)
    return logits, targets, kn


# --------------------------------------------------------------------------
# ResNet-18 encoder (conv1 replaced by 3x3/s1/p1, maxpool removed)
# --------------------------------------------------------------------------
def _init_conv(key, kh, kw, cin, cout):
    std = (2.0 / (kh * kw * cin)) ** 0.5
    return std * jax.random.normal(key, (kh, kw, cin, cout), jnp.float32)


def init_resnet18(key, feature_dim):
    keys = iter(jax.random.split(key, 40))

    def bn(c):
        return (jnp.ones((c,), jnp.float32), jnp.zeros((c,), jnp.float32))

    params = {'stem_conv': _init_conv(next(keys), 3, 3, 3, 64),
              'stem_bn': bn(64)}
    cfg = [(64, 64, 1), (64, 128, 2), (128, 256, 2), (256, 512, 2)]
    layers = []
    for cin, cout, stride in cfg:
        blocks = []
        for bi in range(2):
            s = stride if bi == 0 else 1
            ic = cin if bi == 0 else cout
            blk = {'stride': s,
                   'conv1': _init_conv(next(keys), 3, 3, ic, cout),
                   'bn1': bn(cout),
                   'conv2': _init_conv(next(keys), 3, 3, cout, cout),
                   'bn2': bn(cout)}
            if s != 1 or ic != cout:
                blk['ds_conv'] = _init_conv(next(keys), 1, 1, ic, cout)
                blk['ds_bn'] = bn(cout)
            blocks.append(blk)
        layers.append(blocks)
    params['layers'] = layers
    params['fc_w'] = jax.random.normal(next(keys), (512, feature_dim),
                                       jnp.float32) * (1.0 / 512 ** 0.5)
    params['fc_b'] = jnp.zeros((feature_dim,), jnp.float32)
    return params


def encoder_forward(params, x, num_splits):
    """x: NHWC float32 -> (N, feature_dim) float32."""
    x = conv2d(x, params['stem_conv'], stride=1, padding=1)
    x = split_batchnorm(x, *params['stem_bn'], num_splits=num_splits, relu=True)
    for blocks in params['layers']:
        for blk in blocks:
            identity = x
            out = conv2d(x, blk['conv1'], stride=blk['stride'], padding=1)
            out = split_batchnorm(out, *blk['bn1'], num_splits=num_splits,
                                  relu=True)
            out = conv2d(out, blk['conv2'], stride=1, padding=1)
            if 'ds_conv' in blk:
                identity = conv2d(x, blk['ds_conv'], stride=blk['stride'],
                                  padding=0)
                identity = split_batchnorm(identity, *blk['ds_bn'],
                                           num_splits=num_splits, relu=False)
            out = split_batchnorm(out, *blk['bn2'], num_splits=num_splits,
                                  relu=True, residual=identity)
            x = out
    feat = jnp.mean(x.astype(jnp.float32), axis=(1, 2))   # AvgPool + Flatten
    return pallas_matmul(feat, params['fc_w'], bias=params['fc_b'],
                         out_dtype=jnp.float32)


# --------------------------------------------------------------------------
# SingleGPUMoCo forward
# --------------------------------------------------------------------------
def single_gpu_moco_forward(params, buffers, im_q, im_k, labels, *,
                            T, num_splits, shuffle_key):
    queue, label_queue, queue_ptr = buffers
    # NCHW (PyTorch) -> NHWC (internal)
    im_q = jnp.transpose(im_q, (0, 2, 3, 1)).astype(jnp.float32)
    im_k = jnp.transpose(im_k, (0, 2, 3, 1)).astype(jnp.float32)
    N = labels.shape[0]

    q = encoder_forward(params, im_q, num_splits)

    # momentum update: encoder_k starts as an exact copy of encoder_q, so
    # m*param_k + (1-m)*param_q == param_q  ->  reuse the same params.
    idx_shuffle = jax.random.permutation(shuffle_key, N)   # deterministic
    idx_unshuffle = jnp.argsort(idx_shuffle)
    k = encoder_forward(params, im_k[idx_shuffle], num_splits)
    k = k[idx_unshuffle]        # labels[idx_shuffle][idx_unshuffle] == labels

    logits, targets, k_norm = moco_head(q, k, queue, labels, label_queue, T)

    # functional _dequeue_and_enqueue (torch does it as a buffer side effect)
    Kq = queue.shape[1]
    assert Kq % N == 0
    new_queue = jax.lax.dynamic_update_slice(queue, k_norm.T, (0, queue_ptr))
    new_label_queue = jax.lax.dynamic_update_slice(
        label_queue, labels.astype(label_queue.dtype), (queue_ptr,))
    new_ptr = (queue_ptr + N) % Kq

    # TODO(synk): torch returns int64 fake targets; JAX default is int32.
    fake_targets = jnp.zeros((N,), jnp.int32)
    return (logits, targets, fake_targets), (new_queue, new_label_queue,
                                             new_ptr)


if __name__ == "__main__":
    key = jax.random.PRNGKey(0)
    k_imq, k_imk, k_par, k_que, k_shuf = jax.random.split(key, 5)

    # small shapes consistent with the module
    N, dim, K, bn_splits, T, HW = 4, 32, 16, 2, 0.1, 16

    im_q = jax.random.normal(k_imq, (N, 3, HW, HW), jnp.float32)   # NCHW
    im_k = jax.random.normal(k_imk, (N, 3, HW, HW), jnp.float32)   # NCHW
    labels = jnp.array([-1, 3, 7, -1], dtype=jnp.int32)

    params = init_resnet18(k_par, dim)
    queue = jax.random.normal(k_que, (dim, K), jnp.float32)
    queue = queue / jnp.linalg.norm(queue, axis=0, keepdims=True)
    label_queue = jnp.full((K,), -1, jnp.int32)
    buffers = (queue, label_queue, 0)

    (logits, targets, fake_targets), new_buffers = single_gpu_moco_forward(
        params, buffers, im_q, im_k, labels,
        T=T, num_splits=bn_splits, shuffle_key=k_shuf)
    jax.block_until_ready((logits, targets, fake_targets, new_buffers[0]))

    assert logits.shape == (N, 1 + K)
    assert targets.shape == (N, 1 + K)
    assert fake_targets.shape == (N,)
    assert bool(jnp.all(jnp.isfinite(logits)))

    # ---- self-check 1: fused stride-1 conv kernel vs. f32 reference ----
    cx = jax.random.normal(jax.random.PRNGKey(1), (2, 8, 8, 16), jnp.float32)
    cw = 0.1 * jax.random.normal(jax.random.PRNGKey(2), (3, 3, 16, 32),
                                 jnp.float32)
    y_pal = conv2d(cx, cw, stride=1, padding=1).astype(jnp.float32)
    xb = cx.astype(jnp.bfloat16).astype(jnp.float32)
    wb = cw.astype(jnp.bfloat16).astype(jnp.float32)
    xp = jnp.pad(xb, ((0, 0), (1, 1), (1, 1), (0, 0)))
    cols = [xp[:, i:i + 8, j:j + 8, :] for i in range(3) for j in range(3)]
    y_ref = jnp.einsum('nhwk,ko->nhwo', jnp.concatenate(cols, axis=-1),
                       wb.reshape(9 * 16, 32),
                       precision=jax.lax.Precision.HIGHEST)
    assert bool(jnp.allclose(y_pal, y_ref, atol=5e-2, rtol=5e-2))

    # ---- self-check 2: fused stride-2 conv kernel vs. f32 reference ----
    y2_pal = conv2d(cx, cw, stride=2, padding=1).astype(jnp.float32)
    cols2 = [xp[:, i:i + 2 * 4:2, j:j + 2 * 4:2, :]
             for i in range(3) for j in range(3)]
    y2_ref = jnp.einsum('nhwk,ko->nhwo', jnp.concatenate(cols2, axis=-1),
                        wb.reshape(9 * 16, 32),
                        precision=jax.lax.Precision.HIGHEST)
    assert y2_pal.shape == (2, 4, 4, 32)
    assert bool(jnp.allclose(y2_pal, y2_ref, atol=5e-2, rtol=5e-2))

    # ---- self-check 3: tiled two-pass SplitBatchNorm vs. f32 reference ----
    bx = jax.random.normal(jax.random.PRNGKey(3), (4, 4, 4, 16), jnp.float32)
    bg = 1.0 + 0.1 * jax.random.normal(jax.random.PRNGKey(4), (16,),
                                       jnp.float32)
    bb = 0.1 * jax.random.normal(jax.random.PRNGKey(5), (16,), jnp.float32)
    y_pal = split_batchnorm(bx, bg, bb, num_splits=2, relu=True)
    y_pal = y_pal.astype(jnp.float32)
    xg = bx.reshape(2, 2, 16, 16)
    mu = xg.mean(axis=(0, 2), keepdims=True)
    va = ((xg - mu) ** 2).mean(axis=(0, 2), keepdims=True)
    y_ref = (xg - mu) / jnp.sqrt(va + 1e-5) * bg.reshape(1, 1, 1, 16) \
        + bb.reshape(1, 1, 1, 16)
    y_ref = jnp.maximum(y_ref, 0.0).reshape(4, 4, 4, 16)
    assert bool(jnp.allclose(y_pal, y_ref, atol=3e-2, rtol=3e-2))

    print("KERNEL_OK")
</pallas_src>

<mosaic_0001>
module attributes {stable_mosaic.version = 11 : i64} {
  func.func @kernel(%arg0: i32, %arg1: i32, %arg2: i32, %arg3: memref<512x27xbf16, #tpu.memory_space<vmem>>, %arg4: memref<27x128xbf16, #tpu.memory_space<vmem>>, %arg5: memref<512x128xbf16, #tpu.memory_space<vmem>>, %arg6: memref<512x128xf32, #tpu.memory_space<vmem>>) attributes {dimension_semantics = [#tpu.dimension_semantics<parallel>, #tpu.dimension_semantics<parallel>, #tpu.dimension_semantics<arbitrary>], iteration_bounds = array<i64: 2, 1, 1>, scalar_prefetch = 0 : i64, scratch_operands = 1 : i64, tpu.core_type = #tpu.core_type<tc>, window_params = [{transform_indices = @transform_0, window_bounds = array<i64: 512, 27>}, {transform_indices = @transform_1, window_bounds = array<i64: 27, 128>}, {transform_indices = @transform_2, window_bounds = array<i64: 512, 128>}]} {
    %c0_i32 = arith.constant 0 : i32
    %0 = arith.cmpi eq, %arg2, %c0_i32 : i32
    %1 = arith.extui %0 : i1 to i32
    %c0_i32_0 = arith.constant 0 : i32
    %2 = arith.cmpi ne, %1, %c0_i32_0 : i32
    scf.if %2 {
      %cst_10 = arith.constant 0.000000e+00 : f32
      %12 = vector.broadcast %cst_10 : f32 to vector<512x128xf32>
      %c0_11 = arith.constant 0 : index
      %c0_12 = arith.constant 0 : index
      %13 = vector.load %arg6[%c0_11, %c0_12] : memref<512x128xf32, #tpu.memory_space<vmem>>, vector<512x128xf32>
      tpu.vector_store %arg6[%c0_11, %c0_12], %12 {strides = array<i32>} : memref<512x128xf32, #tpu.memory_space<vmem>>, vector<512x128xf32>,
    } else {
    }
    %c0 = arith.constant 0 : index
    %c0_1 = arith.constant 0 : index
    %3 = vector.load %arg6[%c0, %c0_1] : memref<512x128xf32, #tpu.memory_space<vmem>>, vector<512x128xf32>
    %c0_2 = arith.constant 0 : index
    %c0_3 = arith.constant 0 : index
    %4 = vector.load %arg3[%c0_2, %c0_3] : memref<512x27xbf16, #tpu.memory_space<vmem>>, vector<512x27xbf16>
    %c0_4 = arith.constant 0 : index
    %c0_5 = arith.constant 0 : index
    %5 = vector.load %arg4[%c0_4, %c0_5] : memref<27x128xbf16, #tpu.memory_space<vmem>>, vector<27x128xbf16>
    %cst = arith.constant dense<0.000000e+00> : vector<512x128xf32>
    %6 = tpu.matmul %4, %5, %cst {dimension_numbers = #tpu.dot_dimension_numbers<[1], [0], [0], [1], [0, 0, 1, 1], [], []>} : vector<512x27xbf16>, vector<27x128xbf16>, vector<512x128xf32> -> vector<512x128xf32>
    %7 = arith.addf %3, %6 : vector<512x128xf32>
    %c0_6 = arith.constant 0 : index
    %c0_7 = arith.constant 0 : index
    %8 = vector.load %arg6[%c0_6, %c0_7] : memref<512x128xf32, #tpu.memory_space<vmem>>, vector<512x128xf32>
    tpu.vector_store %arg6[%c0_6, %c0_7], %7 {strides = array<i32>} : memref<512x128xf32, #tpu.memory_space<vmem>>, vector<512x128xf32>,
    %c0_i32_8 = arith.constant 0 : i32
    %9 = arith.cmpi eq, %arg2, %c0_i32_8 : i32
    %10 = arith.extui %9 : i1 to i32
    %c0_i32_9 = arith.constant 0 : i32
    %11 = arith.cmpi ne, %10, %c0_i32_9 : i32
    scf.if %11 {
      %c0_10 = arith.constant 0 : index
      %c0_11 = arith.constant 0 : index
      %12 = vector.load %arg6[%c0_10, %c0_11] : memref<512x128xf32, #tpu.memory_space<vmem>>, vector<512x128xf32>
      %13 = arith.truncf %12 : vector<512x128xf32> to vector<512x128xbf16>
      %c0_12 = arith.constant 0 : index
      %c0_13 = arith.constant 0 : index
      %14 = vector.load %arg5[%c0_12, %c0_13] : memref<512x128xbf16, #tpu.memory_space<vmem>>, vector<512x128xbf16>
      tpu.vector_store %arg5[%c0_12, %c0_13], %13 {strides = array<i32>} : memref<512x128xbf16, #tpu.memory_space<vmem>>, vector<512x128xbf16>,
    } else {
    }
    return
  }
  func.func @transform_0(%arg0: i32, %arg1: i32, %arg2: i32) -> (i32, i32) {
    %c0_i32 = arith.constant 0 : i32
    return %arg0, %arg2 : i32, i32
  }
  func.func @transform_1(%arg0: i32, %arg1: i32, %arg2: i32) -> (i32, i32) {
    %c0_i32 = arith.constant 0 : i32
    return %arg2, %arg1 : i32, i32
  }
  func.func @transform_2(%arg0: i32, %arg1: i32, %arg2: i32) -> (i32, i32) {
    %c0_i32 = arith.constant 0 : i32
    return %arg0, %arg1 : i32, i32
  }
}

</mosaic_0001>

<bundles_post_ra>
// kernel: tpu_custom_call.1
= control target key start
LH: loop header
LB: loop body
LE: loop exit
PB: predicated region body
PF: predicated region fallthrough
CT: control target
= control target key end

     0   :  { %7 = vsyncpa [#allocation4], 0  ;;  %s2733_s0 = inlined_call_operand.hbm [shape: bf16[1024,27], index: 0, kind: input, shape index: {}]   ;;  %s2734_s1 = inlined_call_operand.hbm [shape: bf16[27,128], index: 1, kind: input, shape index: {}]   ;;  %s2735_s2 = inlined_call_operand.hbm [shape: bf16[1024,128], index: 2, kind: output, shape index: {}]  }
   0x1   :  { %9 = vsyncpa [#allocation4 + $0x1], 0 }
   0x2   :  { %10 = vsyncpa [#allocation7], 0 }
   0x3   :  { %11 = vsyncpa [#allocation5], 0 }
   0x4   :  { %13 = vsyncpa [#allocation5 + $0x1], 0  ;;  %s2403_s9 = smov 0   ;;  %s2405_s10 = smov 0  }
   0x5   :  { %s2407_s11 = smov 0   ;;  %s2409_s12 = smov 0  }
   0x6   :  { %s2411_s13 = smov 0   ;;  %s2413_s14 = smov 0  }
   0x7 LB: > { %s1612_s15 = sadd.s32 4294967295, %s2378_s14   ;;  %s1613_s16 = sadd.s32 4294967294, %s2378_s14   ;;  %s2378_s14 = sphi %s2413_s14, %s19_s14   ;;  %s2374_s13 = sphi %s2411_s13, %s2759_s13   ;;  %s2370_s12 = sphi %s2409_s12, %s2758_s12   ;;  %s2366_s11 = sphi %s2407_s11, %s2757_s11   ;;  %s2362_s10 = sphi %s2405_s10, %s2756_s10   ;;  %s2358_s9 = sphi %s2403_s9, %s2755_s9  }
   0x8   : > { %p60_p0 = scmp.ne.s32.totalorder %s2362_s10, %s2358_s9  ;;  %p2437_p1 = scmp.eq.s32.totalorder %s1612_s15, 0 }
   0x9   : > { %p2441_p2 = scmp.eq.s32.totalorder %s1612_s15, 1  ;;  %p120_p3 = scmp.eq.s32.totalorder %s1613_s16, 1 }
   0xa   : > { %s2740_s17 = scalar_select %p2437_p1, 1, 0 }
   0xb   : > { %s2741_s18 = scalar_select %p2441_p2, 1, 0 }
   0xc   : > { %p2447_p4 = por %p2437_p1, %p60_p0  ;;  %p1614_p5 = scmp.ge.s32.totalorder %s2378_s14, 1 }
   0xd   : > { %p2452_p6 = por %p120_p3, %p60_p0  ;;  %p127_p7 = scmp.lt.s32.totalorder %s2378_s14, 3 }
   0xe   : > { %s2742_s19 = scalar_select %p2447_p4, 1, 0 }
   0xf   : > { %s2743_s20 = scalar_select %p2452_p6, 1, 0 }
  0x10   : > { %p2457_p8 = pnand %p1614_p5, %p127_p7  ;;  %s2380_s22 = smov [#allocation6]  }
  0x11   : > { %s143_s23 = sshll.u32 %s2380_s22, 4  ;;  %s38_s25 = sadd.s32 1, %s2374_s13  ;;  %s144_s23 = int_to_ptr.vmem [resolvable:$true] %s143_s23 }
  0x12   : > { %s2744_s21 = scalar_select %p2457_p8, 1, 0 }
  0x13   : > { %p2130_p9 = pneg %p2457_p8  ;;  %s2234_s28 = scalar_lea.hbm %s2734_s1, 256 }
  0x14   : > { %p2235_p12 = scmp.ne.s32.totalorder %s2734_s1, %s2234_s28  ;;  %p2241_p5 = scmp.lt.u32.totalorder %s2234_s28, %s2734_s1 }
  0x15   : > { %p2466_p11 = pnand %p2130_p9, %p2437_p1 }
  0x17   : > { %p2236_p13 = pneg %p2466_p11 }
  0x19   : > { %p2237_p0 = pnand %p2236_p13, %p2235_p12 }
  0x1b   : > { %p2238_p3 = pneg %p2237_p0 }
  0x1d   : > { %p2243_p7 = pnand %p2241_p5, %p2238_p3 }
  0x1f   : > { %2246 = shalt.err (!%p2243_p7)
}
  0x20   : > { %s2247_s5 = scalar_lea.vmem %s144_s23, 256  ;;  %p2255_p1 = scmp.lt.s32.totalorder %s144_s23, %s144_s23 }
  0x21   : > { %p2248_p9 = scmp.ne.s32.totalorder %s144_s23, %s2247_s5  ;;  %p2256_p4 = scmp.lt.s32.totalorder %s2247_s5, %s2247_s5 }
  0x23   : > { %p2250_p10 = pnand %p2248_p9, %p2236_p13  ;;  %p2257_p8 = por %p2256_p4, %p2255_p1 }
  0x25   : > { %p2251_p6 = pneg %p2250_p10 }
  0x27   : > { %p2258_p2 = pnand %p2257_p8, %p2251_p6 }
  0x29   : > { %2261 = shalt.err (!%p2258_p2)
}
  0x2a   : > { %s2381_s6 = smov 64   ;;  %s2382_s7 = smov 4  }
  0x2b   : > { %2133 = dma.hbm_to_vmem [thread:$0]  (!%p2466_p11), %s2734_s1, 256, %s144_s23, [#allocation7], %s2381_s6, %s2381_s6, %s2382_s7  }
  0x2c   : > { %p40_p1 = scmp.ge.s32.totalorder %s38_s25, 2  ;;  %s47_s16 = sadd.s32 1, %s2366_s11 }
  0x2d   : > { %p54_p2 = scmp.ne.s32.totalorder %s2366_s11, %s2362_s10  ;;  %p55_p4 = scmp.eq.s32.totalorder %s2378_s14, 0 }
  0x2e   : > { %s2761_s25 = smov (%p40_p1, %s38_s25), 0  ;;  %p2747_p8 = scmp.ne.s32.totalorder %s2741_s18, 0 }
  0x2f   : > { %p2496_p6 = por %p55_p4, %p54_p2  ;;  %s42_s26 = ssub.s32 %s2374_s13, %s2761_s25 }
  0x30   : > { %p2502_p10 = por %p2747_p8, %p54_p2  ;;  %p2143_p12 = scmp.lt.s32.totalorder %s2378_s14, 2 }
  0x31   : > { %p45_p11 = scmp.eq.s32.totalorder %s42_s26, 0  ;;  %s157_s23 = sand.u32 1, %s2366_s11  }
  0x32   : > { %s1617_s27 = sshll.u32 %s157_s23, 8  ;;  %s1759_s29 = sshll.u32 %s2374_s13, 12 }
  0x33   : > { %s2511_s28 = scalar_select %p45_p11, %s2366_s11, %s47_s16  }
  0x34   : > { %s2517_s4 = scalar_lea.hbm %s2733_s0, %s1759_s29  ;;  %s161_s18 = scalar_lea.vmem [#allocation3], %s1617_s27 }
  0x35   : > { %s169_s5 = sshll.u32 %s161_s18, 4  ;;  %p2523_p13 = pnand %p2143_p12, %p2496_p6  ;;  %s2519_s5 = int_to_ptr.vmem [resolvable:$true] %s169_s5 }
  0x36   : > { %s2527_s15 = scalar_lea.sflag [#allocation4], %s157_s23  ;;  %s2262_s16 = scalar_lea.hbm %s2517_s4, 4096 }
  0x37   : > { %p2263_p0 = scmp.ne.s32.totalorder %s2517_s4, %s2262_s16  ;;  %p2264_p3 = pneg %p2523_p13 }
  0x38   : > { %s2267_s22 = scalar_lea.hbm %s2733_s0, 8192  ;;  %p2268_p9 = scmp.lt.u32.totalorder %s2517_s4, %s2733_s0 }
  0x39   : > { %p2265_p5 = pnand %p2264_p3, %p2263_p0  ;;  %p2269_p1 = scmp.lt.u32.totalorder %s2267_s22, %s2262_s16 }
  0x3a   : > { %p2271_p4 = scmp.lt.u32.totalorder %s2262_s16, %s2517_s4 }
  0x3b   : > { %p2266_p7 = pneg %p2265_p5  ;;  %p2270_p2 = por %p2269_p1, %p2268_p9 }
  0x3d   : > { %p2272_p6 = por %p2271_p4, %p2270_p2 }
  0x3f   : > { %p2273_p8 = pnand %p2272_p6, %p2266_p7 }
  0x41   : > { %2276 = shalt.err (!%p2273_p8)
}
  0x42   : > { %s2277_s23 = scalar_lea.vmem %s2519_s5, 4096  ;;  %s2383_s3 = smov [#allocation3]  }
  0x43   : > { %p2278_p12 = scmp.ne.s32.totalorder %s2519_s5, %s2277_s23  ;;  %s2282_s18 = sshll.u32 %s2383_s3, 4  ;;  %s2283_s18 = int_to_ptr.vmem [resolvable:$false] %s2282_s18 }
  0x44   : > { %s2284_s26 = scalar_lea.vmem %s2283_s18, 8192  ;;  %p2285_p5 = scmp.lt.s32.totalorder %s2519_s5, %s2283_s18 }
  0x45   : > { %p2280_p11 = pnand %p2278_p12, %p2264_p3  ;;  %p2286_p9 = scmp.lt.s32.totalorder %s2284_s26, %s2277_s23 }
  0x47   : > { %p2281_p0 = pneg %p2280_p11  ;;  %p2287_p1 = por %p2286_p9, %p2285_p5 }
  0x49   : > { %p2288_p2 = pnand %p2287_p1, %p2281_p0 }
  0x4b   : > { %2291 = shalt.err (!%p2288_p2)
}
  0x4c   : > { %2137 = dma.hbm_to_vmem [thread:$0]  (!%p2523_p13), %s2517_s4, 4096, %s2519_s5, %s2527_s15, %s2381_s6, %s2381_s6, %s2382_s7  }
  0x4d   : > { %p2750_p3 = scmp.ne.s32.totalorder %s2744_s21, 0 }
  0x4e   : > { %s2561_s16 = sand.u32 (!%p2750_p3), 1, %s2362_s10   ;;  %p2751_p7 = scmp.ne.s32.totalorder (!%p2750_p3), %s2742_s19, 0 }
  0x4f   : > { %181 = sbr.rel (%p2750_p3) target bundleno = 388 (0x184), region = 28  ;;  %s1621_s27 = sshll.u32 (!%p2750_p3), %s2561_s16, 8 }
  0x50   : > { %s184_s22 = scalar_lea.sflag (!%p2750_p3), [#allocation4], %s2561_s16  ;;  %s2567_s8 = scalar_lea.vmem (!%p2750_p3), [#allocation3], %s1621_s27 }
  0x56   : > { %2345 = dma.done.wait (%p2751_p7), %s184_s22, 4096  }
  0x57   : > { %2347 = vsyncadd (%p2751_p7), %s184_s22, 4294963200  ;;  %p2752_p13 = scmp.ne.s32.totalorder %s2740_s17, 0 }
  0x59   : > { %2349 = dma.done.wait (%p2752_p13), [#allocation7], 256  }
  0x5a   : > { %2351 = vsyncadd (%p2752_p13), [#allocation7], 4294967040  ;;  %vm684_vm0 = vcmask 1044480   ;;  %vm685_vm1 = vcmask 1045504   ;;  %v2384_v0 = vmov 65535   ;;  %vm587_vm2 = vcmask 220160  }
  0x5b   : > { %v686_v1 = vsel %vm684_vm0, 4294967295, %v2384_v0  ;;  %v2200_v2 = vld [vmem:[#allocation6] sm:$0xff]   ;;  %v2201_v4 = vld [vmem:[#allocation6 + $0x8] sm:$0x3f]   ;;  %v2206_v10 = vld [vmem:[%s2567_s8 + $0x10] sm:$0xff]   ;;  %s2643_s17 = scalar_lea.vmem [#allocation8], %s1621_s27 }
  0x5c   : > { %v687_v3 = vsel %vm685_vm1, %v686_v1, 0  ;;  %2050 = vmatprep.subr.bf16.mxu0 %v2200_v2  ;;  %2118 = vmatprep.subr.bf16.mxu1 %v2200_v2  ;;  %v2202_v5 = vld [vmem:[%s2567_s8] sm:$0xff]   ;;  %v2204_v8 = vld [vmem:[%s2567_s8 + $0x8] sm:$0xff]   ;;  %v2207_v11 = vld [vmem:[%s2567_s8 + $0x90] sm:$0xff]   ;;  %s1824_s19 = sshll.u32 %s2370_s12, 12  ;;  %s1510_s21 = sshll.u32 %s2643_s17, 4  ;;  %s2680_s21 = int_to_ptr.vmem [resolvable:$true] %s1510_s21 }
  0x5d   : > { %2051 = vmatpush3.bf16.msra.mxu0 %v2200_v2  ;;  %2120 = vmatpush3.bf16.msra.mxu1 %v2200_v2  ;;  %v689_v6 = vand.u32 %v2201_v4, %v687_v3  ;;  %v2203_v7 = vld [vmem:[%s2567_s8 + $0x80] sm:$0xff]   ;;  %v2205_v9 = vld [vmem:[%s2567_s8 + $0x88] sm:$0xff]   ;;  %v2208_v12 = vld [vmem:[%s2567_s8 + $0x18] sm:$0xff]   ;;  %s2678_s4 = scalar_lea.hbm %s2735_s2, %s1824_s19  ;;  %s1496_s12 = scalar_lea.sflag [#allocation5], %s2561_s16 }
  0x5e   : > { %2054 = vmatprep.mubr.msk.bf16.mxu0 %vm587_vm2, %v2202_v5  ;;  %2086 = vmatprep.mubr.msk.bf16.mxu1 %vm587_vm2, %v2203_v7  ;;  %v2209_v13 = vld [vmem:[%s2567_s8 + $0x98] sm:$0xff]   ;;  %v2210_v14 = vld [vmem:[%s2567_s8 + $0x20] sm:$0xff]   ;;  %v2212_v16 = vld [vmem:[%s2567_s8 + $0x28] sm:$0xff]   ;;  %s2292_s5 = scalar_lea.vmem %s2680_s21, 4096  ;;  %s2385_s15 = smov [#allocation8]  }
  0x5f   : > { %2052 = vmatprep.subr.bf16.mxu0 %v689_v6  ;;  %2119 = vmatprep.subr.bf16.mxu1 %v689_v6  ;;  %v2211_v15 = vld [vmem:[%s2567_s8 + $0xa0] sm:$0xff]   ;;  %v2213_v17 = vld [vmem:[%s2567_s8 + $0xa8] sm:$0xff]   ;;  %v2214_v18 = vld [vmem:[%s2567_s8 + $0x30] sm:$0xff]   ;;  %p2293_p4 = scmp.ne.s32.totalorder %s2680_s21, %s2292_s5  ;;  %s2296_s29 = sshll.u32 %s2385_s15, 4  ;;  %s2297_s29 = int_to_ptr.vmem [resolvable:$false] %s2296_s29 }
  0x60   : > { %v2215_v19 = vld [vmem:[%s2567_s8 + $0xb0] sm:$0xff]   ;;  %v2216_v20 = vld [vmem:[%s2567_s8 + $0x38] sm:$0xff]   ;;  %v2218_v22 = vld [vmem:[%s2567_s8 + $0x40] sm:$0xff]   ;;  %s2298_s30 = scalar_lea.vmem %s2297_s29, 8192  ;;  %p2299_p12 = scmp.lt.s32.totalorder %s2680_s21, %s2297_s29 }
  0x61   : > { %2053 = vmatpush3.bf16.msra.mxu0 %v689_v6  ;;  %2121 = vmatpush3.bf16.msra.mxu1 %v689_v6  ;;  %v2217_v21 = vld [vmem:[%s2567_s8 + $0xb8] sm:$0xff]   ;;  %v2219_v23 = vld [vmem:[%s2567_s8 + $0xc0] sm:$0xff]   ;;  %v2220_v24 = vld [vmem:[%s2567_s8 + $0x48] sm:$0xff]   ;;  %p2294_p6 = pnand %p2293_p4, %p2502_p10  ;;  %p2300_p11 = scmp.lt.s32.totalorder %s2298_s30, %s2292_s5 }
  0x62   : > { %v2221_v25 = vld [vmem:[%s2567_s8 + $0xc8] sm:$0xff]   ;;  %v2222_v26 = vld [vmem:[%s2567_s8 + $0x50] sm:$0xff]   ;;  %v2224_v28 = vld [vmem:[%s2567_s8 + $0x58] sm:$0xff]  }
  0x63   : > { %v2223_v27 = vld [vmem:[%s2567_s8 + $0xd0] sm:$0xff]   ;;  %v2225_v29 = vld [vmem:[%s2567_s8 + $0xd8] sm:$0xff]   ;;  %v2226_v30 = vld [vmem:[%s2567_s8 + $0x60] sm:$0xff]   ;;  %p2295_p8 = pneg %p2294_p6  ;;  %p2301_p0 = por %p2300_p11, %p2299_p12 }
  0x64   : > { %2055 = vmatmul.mubr.msk.bf16.vlgmr.msra.gmra.mrb[0].mxu0 %vm587_vm2, %v2204_v8  ;;  %2087 = vmatmul.mubr.msk.bf16.vlgmr.msra.gmra.mrb[0].mxu1 %vm587_vm2, %v2205_v9  ;;  %v2227_v31 = vld [vmem:[%s2567_s8 + $0xe0] sm:$0xff]   ;;  %v2228_v32 = vld [vmem:[%s2567_s8 + $0x68] sm:$0xff]   ;;  %v2230_v34 = vld [vmem:[%s2567_s8 + $0x70] sm:$0xff]  }
  0x65   : > { %2058 = vmatprep.mubr.msk.bf16.mxu0 %vm587_vm2, %v2206_v10  ;;  %2090 = vmatprep.mubr.msk.bf16.mxu1 %vm587_vm2, %v2207_v11  ;;  %v2229_v33 = vld [vmem:[%s2567_s8 + $0xe8] sm:$0xff]   ;;  %v2231_v35 = vld [vmem:[%s2567_s8 + $0xf0] sm:$0xff]   ;;  %v2232_v36 = vld [vmem:[%s2567_s8 + $0x78] sm:$0xff]   ;;  %p2302_p5 = pnand %p2301_p0, %p2295_p8 }
  0x66   : > { %v2233_v37 = vld [vmem:[%s2567_s8 + $0xf8] sm:$0xff]  }
  0x6c   : > { %2059 = vmatmul.mubr.msk.bf16.gmra.mrb[4].mxu0 %vm587_vm2, %v2208_v12  ;;  %2091 = vmatmul.mubr.msk.bf16.gmra.mrb[4].mxu1 %vm587_vm2, %v2209_v13 }
  0x6d   : > { %2062 = vmatprep.mubr.msk.bf16.mxu0 %vm587_vm2, %v2210_v14  ;;  %2094 = vmatprep.mubr.msk.bf16.mxu1 %vm587_vm2, %v2211_v15 }
  0x74   : > { %2063 = vmatmul.mubr.msk.bf16.gmra.mrb[8].mxu0 %vm587_vm2, %v2212_v16  ;;  %2095 = vmatmul.mubr.msk.bf16.gmra.mrb[8].mxu1 %vm587_vm2, %v2213_v17 }
  0x75   : > { %2066 = vmatprep.mubr.msk.bf16.mxu0 %vm587_vm2, %v2214_v18  ;;  %2098 = vmatprep.mubr.msk.bf16.mxu1 %vm587_vm2, %v2215_v19 }
  0x7c   : > { %2067 = vmatmul.mubr.msk.bf16.gmra.mrb[12].mxu0 %vm587_vm2, %v2216_v20  ;;  %2099 = vmatmul.mubr.msk.bf16.gmra.mrb[12].mxu1 %vm587_vm2, %v2217_v21 }
  0x7d   : > { %2070 = vmatprep.mubr.msk.bf16.mxu0 %vm587_vm2, %v2218_v22  ;;  %2102 = vmatprep.mubr.msk.bf16.mxu1 %vm587_vm2, %v2219_v23 }
  0x84   : > { %2071 = vmatmul.mubr.msk.bf16.gmra.mrb[16].mxu0 %vm587_vm2, %v2220_v24  ;;  %2103 = vmatmul.mubr.msk.bf16.gmra.mrb[16].mxu1 %vm587_vm2, %v2221_v25 }
  0x85   : > { %2074 = vmatprep.mubr.msk.bf16.mxu0 %vm587_vm2, %v2222_v26  ;;  %2106 = vmatprep.mubr.msk.bf16.mxu1 %vm587_vm2, %v2223_v27 }
  0x8c   : > { %2075 = vmatmul.mubr.msk.bf16.gmra.mrb[20].mxu0 %vm587_vm2, %v2224_v28  ;;  %2107 = vmatmul.mubr.msk.bf16.gmra.mrb[20].mxu1 %vm587_vm2, %v2225_v29 }
  0x8d   : > { %2078 = vmatprep.mubr.msk.bf16.mxu0 %vm587_vm2, %v2226_v30  ;;  %2110 = vmatprep.mubr.msk.bf16.mxu1 %vm587_vm2, %v2227_v31 }
  0x94   : > { %2079 = vmatmul.mubr.msk.bf16.gmra.mrb[24].mxu0 %vm587_vm2, %v2228_v32  ;;  %2111 = vmatmul.mubr.msk.bf16.gmra.mrb[24].mxu1 %vm587_vm2, %v2229_v33 }
  0x95   : > { %2082 = vmatprep.mubr.msk.bf16.mxu0 %vm587_vm2, %v2230_v34  ;;  %2114 = vmatprep.mubr.msk.bf16.mxu1 %vm587_vm2, %v2231_v35 }
  0x9c   : > { %2083 = vmatmul.mubr.msk.bf16.gmra.mrb[28].mxu0 %vm587_vm2, %v2232_v36  ;;  %2115 = vmatmul.mubr.msk.bf16.gmra.mrb[28].mxu1 %vm587_vm2, %v2233_v37 }
 0x137   : > { %v2056_v38 = vpop.f32.mrb[0].mxu0  ;;  %v2088_v39 = vpop.f32.mrb[0].mxu1 }
 0x138   : > { %v725_v40 = vpop.f32.mrb[1].mxu0  ;;  %v853_v41 = vpop.f32.mrb[1].mxu1 }
 0x139   : > { %v2057_v42 = vpop.f32.mrb[2].mxu0  ;;  %v2089_v43 = vpop.f32.mrb[2].mxu1 }
 0x13a   : > { %v1833_v44 = vpack.c.bf16 %v2057_v42, %v2056_v38  ;;  %v1913_v45 = vpack.c.bf16 %v2089_v43, %v2088_v39  ;;  %v728_v46 = vpop.f32.mrb[3].mxu0  ;;  %v856_v47 = vpop.f32.mrb[3].mxu1 }
 0x13b   : > { %v1828_v48 = vpack.c.bf16 %v728_v46, %v725_v40  ;;  %v1908_v49 = vpack.c.bf16 %v856_v47, %v853_v41 }
 0x13c   : > { %1985 = vst [vmem:[%s2643_s17 + $0x8] sm:$0xff] %v1833_v44   ;;  %2001 = vst [vmem:[%s2643_s17 + $0x88] sm:$0xff] %v1913_v45  }
 0x13d   : > { %1829 = vst [vmem:[%s2643_s17] sm:$0xff] %v1828_v48   ;;  %2000 = vst [vmem:[%s2643_s17 + $0x80] sm:$0xff] %v1908_v49  }
 0x13f   : > { %v2060_v50 = vpop.f32.mrb[4].mxu0  ;;  %v2092_v51 = vpop.f32.mrb[4].mxu1 }
 0x140   : > { %v741_v52 = vpop.f32.mrb[5].mxu0  ;;  %v869_v53 = vpop.f32.mrb[5].mxu1 }
 0x141   : > { %v2061_v54 = vpop.f32.mrb[6].mxu0  ;;  %v2093_v55 = vpop.f32.mrb[6].mxu1 }
 0x142   : > { %v1843_v56 = vpack.c.bf16 %v2061_v54, %v2060_v50  ;;  %v1923_v57 = vpack.c.bf16 %v2093_v55, %v2092_v51  ;;  %v744_v58 = vpop.f32.mrb[7].mxu0  ;;  %v872_v59 = vpop.f32.mrb[7].mxu1 }
 0x143   : > { %v1838_v60 = vpack.c.bf16 %v744_v58, %v741_v52  ;;  %v1918_v61 = vpack.c.bf16 %v872_v59, %v869_v53 }
 0x144   : > { %1987 = vst [vmem:[%s2643_s17 + $0x18] sm:$0xff] %v1843_v56   ;;  %2003 = vst [vmem:[%s2643_s17 + $0x98] sm:$0xff] %v1923_v57  }
 0x145   : > { %1986 = vst [vmem:[%s2643_s17 + $0x10] sm:$0xff] %v1838_v60   ;;  %2002 = vst [vmem:[%s2643_s17 + $0x90] sm:$0xff] %v1918_v61  }
 0x147   : > { %v2064_v62 = vpop.f32.mrb[8].mxu0  ;;  %v2096_v63 = vpop.f32.mrb[8].mxu1 }
 0x148   : > { %v757_v0 = vpop.f32.mrb[9].mxu0  ;;  %v885_v1 = vpop.f32.mrb[9].mxu1 }
 0x149   : > { %v2065_v2 = vpop.f32.mrb[10].mxu0  ;;  %v2097_v3 = vpop.f32.mrb[10].mxu1 }
 0x14a   : > { %v1853_v4 = vpack.c.bf16 %v2065_v2, %v2064_v62  ;;  %v1933_v5 = vpack.c.bf16 %v2097_v3, %v2096_v63  ;;  %v760_v6 = vpop.f32.mrb[11].mxu0  ;;  %v888_v7 = vpop.f32.mrb[11].mxu1 }
 0x14b   : > { %v1848_v8 = vpack.c.bf16 %v760_v6, %v757_v0  ;;  %v1928_v9 = vpack.c.bf16 %v888_v7, %v885_v1 }
 0x14c   : > { %1989 = vst [vmem:[%s2643_s17 + $0x28] sm:$0xff] %v1853_v4   ;;  %2005 = vst [vmem:[%s2643_s17 + $0xa8] sm:$0xff] %v1933_v5  }
 0x14d   : > { %1988 = vst [vmem:[%s2643_s17 + $0x20] sm:$0xff] %v1848_v8   ;;  %2004 = vst [vmem:[%s2643_s17 + $0xa0] sm:$0xff] %v1928_v9  }
 0x14f   : > { %v2068_v10 = vpop.f32.mrb[12].mxu0  ;;  %v2100_v11 = vpop.f32.mrb[12].mxu1 }
 0x150   : > { %v773_v12 = vpop.f32.mrb[13].mxu0  ;;  %v901_v13 = vpop.f32.mrb[13].mxu1 }
 0x151   : > { %v2069_v14 = vpop.f32.mrb[14].mxu0  ;;  %v2101_v15 = vpop.f32.mrb[14].mxu1 }
 0x152   : > { %v1863_v16 = vpack.c.bf16 %v2069_v14, %v2068_v10  ;;  %v1943_v17 = vpack.c.bf16 %v2101_v15, %v2100_v11  ;;  %v776_v18 = vpop.f32.mrb[15].mxu0  ;;  %v904_v19 = vpop.f32.mrb[15].mxu1 }
 0x153   : > { %v1858_v20 = vpack.c.bf16 %v776_v18, %v773_v12  ;;  %v1938_v21 = vpack.c.bf16 %v904_v19, %v901_v13 }
 0x154   : > { %1991 = vst [vmem:[%s2643_s17 + $0x38] sm:$0xff] %v1863_v16   ;;  %2007 = vst [vmem:[%s2643_s17 + $0xb8] sm:$0xff] %v1943_v17  }
 0x155   : > { %1990 = vst [vmem:[%s2643_s17 + $0x30] sm:$0xff] %v1858_v20   ;;  %2006 = vst [vmem:[%s2643_s17 + $0xb0] sm:$0xff] %v1938_v21  }
 0x157   : > { %v2072_v22 = vpop.f32.mrb[16].mxu0  ;;  %v2104_v23 = vpop.f32.mrb[16].mxu1 }
 0x158   : > { %v789_v24 = vpop.f32.mrb[17].mxu0  ;;  %v917_v25 = vpop.f32.mrb[17].mxu1 }
 0x159   : > { %v2073_v26 = vpop.f32.mrb[18].mxu0  ;;  %v2105_v27 = vpop.f32.mrb[18].mxu1 }
 0x15a   : > { %v1873_v28 = vpack.c.bf16 %v2073_v26, %v2072_v22  ;;  %v1953_v29 = vpack.c.bf16 %v2105_v27, %v2104_v23  ;;  %v792_v30 = vpop.f32.mrb[19].mxu0  ;;  %v920_v31 = vpop.f32.mrb[19].mxu1 }
 0x15b   : > { %v1868_v32 = vpack.c.bf16 %v792_v30, %v789_v24  ;;  %v1948_v33 = vpack.c.bf16 %v920_v31, %v917_v25 }
 0x15c   : > { %1993 = vst [vmem:[%s2643_s17 + $0x48] sm:$0xff] %v1873_v28   ;;  %2009 = vst [vmem:[%s2643_s17 + $0xc8] sm:$0xff] %v1953_v29  }
 0x15d   : > { %1992 = vst [vmem:[%s2643_s17 + $0x40] sm:$0xff] %v1868_v32   ;;  %2008 = vst [vmem:[%s2643_s17 + $0xc0] sm:$0xff] %v1948_v33  }
 0x15f   : > { %v2076_v34 = vpop.f32.mrb[20].mxu0  ;;  %v2108_v35 = vpop.f32.mrb[20].mxu1 }
 0x160   : > { %v805_v36 = vpop.f32.mrb[21].mxu0  ;;  %v933_v37 = vpop.f32.mrb[21].mxu1 }
 0x161   : > { %v2077_v38 = vpop.f32.mrb[22].mxu0  ;;  %v2109_v39 = vpop.f32.mrb[22].mxu1 }
 0x162   : > { %v1883_v40 = vpack.c.bf16 %v2077_v38, %v2076_v34  ;;  %v1963_v41 = vpack.c.bf16 %v2109_v39, %v2108_v35  ;;  %v808_v42 = vpop.f32.mrb[23].mxu0  ;;  %v936_v43 = vpop.f32.mrb[23].mxu1 }
 0x163   : > { %v1878_v44 = vpack.c.bf16 %v808_v42, %v805_v36  ;;  %v1958_v45 = vpack.c.bf16 %v936_v43, %v933_v37 }
 0x164   : > { %1995 = vst [vmem:[%s2643_s17 + $0x58] sm:$0xff] %v1883_v40   ;;  %2011 = vst [vmem:[%s2643_s17 + $0xd8] sm:$0xff] %v1963_v41  }
 0x165   : > { %1994 = vst [vmem:[%s2643_s17 + $0x50] sm:$0xff] %v1878_v44   ;;  %2010 = vst [vmem:[%s2643_s17 + $0xd0] sm:$0xff] %v1958_v45  }
 0x167   : > { %v2080_v46 = vpop.f32.mrb[24].mxu0  ;;  %v2112_v47 = vpop.f32.mrb[24].mxu1 }
 0x168   : > { %v821_v48 = vpop.f32.mrb[25].mxu0  ;;  %v949_v49 = vpop.f32.mrb[25].mxu1 }
 0x169   : > { %v2081_v50 = vpop.f32.mrb[26].mxu0  ;;  %v2113_v51 = vpop.f32.mrb[26].mxu1 }
 0x16a   : > { %v1893_v52 = vpack.c.bf16 %v2081_v50, %v2080_v46  ;;  %v1973_v53 = vpack.c.bf16 %v2113_v51, %v2112_v47  ;;  %v824_v54 = vpop.f32.mrb[27].mxu0  ;;  %v952_v55 = vpop.f32.mrb[27].mxu1 }
 0x16b   : > { %v1888_v56 = vpack.c.bf16 %v824_v54, %v821_v48  ;;  %v1968_v57 = vpack.c.bf16 %v952_v55, %v949_v49 }
 0x16c   : > { %1997 = vst [vmem:[%s2643_s17 + $0x68] sm:$0xff] %v1893_v52   ;;  %2013 = vst [vmem:[%s2643_s17 + $0xe8] sm:$0xff] %v1973_v53  }
 0x16d   : > { %1996 = vst [vmem:[%s2643_s17 + $0x60] sm:$0xff] %v1888_v56   ;;  %2012 = vst [vmem:[%s2643_s17 + $0xe0] sm:$0xff] %v1968_v57  }
 0x16f   : > { %v2084_v58 = vpop.f32.mrb[28].mxu0  ;;  %v2116_v59 = vpop.f32.mrb[28].mxu1 }
 0x170   : > { %v837_v60 = vpop.f32.mrb[29].mxu0  ;;  %v965_v61 = vpop.f32.mrb[29].mxu1 }
 0x171   : > { %v2085_v62 = vpop.f32.mrb[30].mxu0  ;;  %v2117_v63 = vpop.f32.mrb[30].mxu1 }
 0x172   : > { %v1903_v0 = vpack.c.bf16 %v2085_v62, %v2084_v58  ;;  %v1983_v1 = vpack.c.bf16 %v2117_v63, %v2116_v59  ;;  %v840_v2 = vpop.f32.mrb[31].mxu0  ;;  %v968_v3 = vpop.f32.mrb[31].mxu1 }
 0x173   : > { %v1898_v4 = vpack.c.bf16 %v840_v2, %v837_v60  ;;  %v1978_v5 = vpack.c.bf16 %v968_v3, %v965_v61 }
 0x174   : > { %1999 = vst [vmem:[%s2643_s17 + $0x78] sm:$0xff] %v1903_v0   ;;  %2015 = vst [vmem:[%s2643_s17 + $0xf8] sm:$0xff] %v1983_v1  }
 0x175   : > { %1998 = vst [vmem:[%s2643_s17 + $0x70] sm:$0xff] %v1898_v4   ;;  %2014 = vst [vmem:[%s2643_s17 + $0xf0] sm:$0xff] %v1978_v5  }
 0x176   : > { %2305 = shalt.err (!%p2302_p5)
}
 0x177   : > { %s2306_s23 = scalar_lea.hbm %s2678_s4, 4096  ;;  %s2310_s26 = scalar_lea.hbm %s2735_s2, 8192 }
 0x178   : > { %p2307_p9 = scmp.ne.s32.totalorder %s2678_s4, %s2306_s23  ;;  %p2311_p3 = scmp.lt.u32.totalorder %s2678_s4, %s2735_s2 }
 0x179   : > { %p2312_p7 = scmp.lt.u32.totalorder %s2310_s26, %s2306_s23  ;;  %p2314_p4 = scmp.lt.u32.totalorder %s2306_s23, %s2678_s4 }
 0x17a   : > { %p2308_p1 = pnand %p2307_p9, %p2502_p10 }
 0x17b   : > { %p2313_p13 = por %p2312_p7, %p2311_p3 }
 0x17c   : > { %p2309_p2 = pneg %p2308_p1 }
 0x17d   : > { %p2315_p6 = por %p2314_p4, %p2313_p13 }
 0x17f   : > { %p2316_p8 = pnand %p2315_p6, %p2309_p2 }
 0x181   : > { %2319 = shalt.err (!%p2316_p8)
}
 0x182   : > { %s2386_s8 = smov 64   ;;  %s2387_s17 = smov 4  }
 0x183   : > { %2128 = dma.vmem_to_hbm [thread:$0]  (%p2502_p10), %s2680_s21, 4096, %s2678_s4, %s1496_s12, %s2386_s8, %s2386_s8, %s2387_s17  }
 0x184 PF: > { %s1525_s19 = sand.u32 1, %s2358_s9   ;;  %p2753_p12 = scmp.ne.s32.totalorder %s2743_s20, 0 }
 0x185   : > { %p2754_p11 = scmp.ge.s32.totalorder %s2378_s14, 2  ;;  %s1526_s6 = scalar_lea.sflag [#allocation5], %s1525_s19 }
 0x187   : > { %p2139_p0 = pnand %p2754_p11, %p2753_p12 }
 0x189   : > { %2353 = dma.done.wait (!%p2139_p0), %s1526_s6, 4096  }
 0x18a   : > { %2355 = vsyncadd (!%p2139_p0), %s1526_s6, 4294963200  ;;  %s19_s14 = sadd.s32 1, %s2378_s14   ;;  %s2755_s9 = smov %s2362_s10 }
 0x18b   : > { %p16_p5 = scmp.ge.s32.totalorder %s19_s14, 4   ;;  %s2756_s10 = smov %s2366_s11 }
 0x18c   : > { %s2757_s11 = smov %s2511_s28  ;;  %s2758_s12 = smov %s2374_s13 }
 0x18d   : > { %s2759_s13 = smov %s2761_s25  ;;  %18 = sbr.rel (!%p16_p5) target bundleno = 7 (0x7), region = 86 }
 0x194   :  { %1531 = vsyncpa [#allocation4], 1 }
 0x195   :  { %1533 = vsyncpa [#allocation4 + $0x1], 1 }
 0x196   :  { %1534 = vsyncpa [#allocation7], 1 }
 0x197   :  { %1535 = vsyncpa [#allocation5], 1 }
 0x198   :  { %1537 = vsyncpa [#allocation5 + $0x1], 1 }

</bundles_post_ra>
